<compile_context>
chip_gen: v5e
topology: v5e:2x2
jax: 0.10.0
libtpu: 0.0.40
codegen_flags: <defaults>
</compile_context>

<pallas_src>
import numpy as np
import jax
import jax.numpy as jnp
from jax.experimental import pallas as pl
from jax.experimental.pallas import tpu as pltpu


def _group_sum_kernel(x_ref, o_ref):
    # x_ref: (card, TB, TN) -- every member of each product group for this tile.
    # o_ref: (TB, TN) in the layer's input dtype.
    # Accumulate in f32 (v5e's VPU has no bf16 ALU), cast once on the store.
    card = x_ref.shape[0]
    acc = x_ref[0].astype(jnp.float32)
    for k in range(1, card):  # card is small & static -> fully unrolled VPU adds
        acc = acc + x_ref[k].astype(jnp.float32)
    o_ref[...] = acc.astype(o_ref.dtype)


def _tpu_vmem_and_cores():
    cap, cores = None, 1
    try:
        info = pltpu.get_tpu_info()
        cap = getattr(info, "vmem_capacity_bytes", None)
        for attr in ("num_cores", "core_count", "num_tensorcores"):
            v = getattr(info, attr, None)
            if v:
                cores = int(v)
                break
    except Exception:
        pass
    return cap, cores


def _vmem_plan():
    """Returns (buffer_budget_bytes, explicit_vmem_limit_or_None, num_cores)."""
    cap, cores = _tpu_vmem_and_cores()
    if cap is None:
        # Unknown chip: stay under every generation's default scoped-VMEM limit.
        return 10 << 20, None, cores
    if cap <= (64 << 20) + (1 << 20):
        # v7x-class: 64 MiB physical, 32 MiB default scoped limit, 2 TensorCores.
        return 16 << 20, 32 << 20, max(cores, 2)
    # v5e / v6e: 128 MiB physical.  Raise the scoped limit explicitly so the bigger
    # buffer budget is always legal (v5e's default scoped limit is only 16 MiB).
    return 24 << 20, 48 << 20, cores


def _pick_tiles(n_rows, n_lanes, card, itemsize, budget, cores):
    # Bytes per (row, lane) element across all pipeline buffers:
    #   double-buffered (card, TB, TN) input + double-buffered (TB, TN) output
    #   + ~2 f32 working tiles of headroom for the in-kernel upcast/adds.
    per_elem = 2 * card * itemsize + 2 * itemsize + 8
    sub = max(8, 32 // itemsize)  # sublane pack: 8 for f32, 16 for bf16

    def rup(v, m):
        return (v + m - 1) // m * m

    # Lane tile first: full lane extent when it fits against a minimal row tile,
    # otherwise the largest multiple of 128 that does.
    tn_cap = max(128, (budget // (sub * per_elem)) // 128 * 128)
    tn = n_lanes if n_lanes <= tn_cap else tn_cap

    # Then grow the row (batch) tile into the remaining budget.
    tn_pad = rup(min(tn, n_lanes), 128)
    tb_cap = max(sub, (budget // (tn_pad * per_elem)) // sub * sub)
    tb = n_rows if n_rows <= tb_cap else tb_cap

    # Megacore: if the whole problem is a single block and >1 TensorCore is present
    # (v7x), split the larger parallel axis so both cores get work.  Never split on
    # single-core v5e/v6e -- it only shrinks tiles for no benefit.
    if cores > 1 and pl.cdiv(n_rows, tb) * pl.cdiv(n_lanes, tn) == 1:
        if n_lanes >= 256:
            tn = rup((n_lanes + 1) // 2, 128)
        elif n_rows >= 2 * sub:
            tb = rup((n_rows + 1) // 2, sub)
    return tb, tn


def _grouped_sum_pallas(x, cardinality):
    B, F, C = x.shape
    card = int(cardinality)
    nfull = F // card          # number of complete groups
    rem = F - nfull * card     # ragged tail features (handled outside the kernel)

    outputs = []
    if nfull > 0:
        n_lanes = nfull * C
        # [B, nfull*card, C] -> [card, B, nfull, C] -> [card, B, nfull*C]
        # One fused XLA transpose copy; both reshapes are free/contiguous.
        x4 = x[:, : nfull * card, :].reshape(B, nfull, card, C)
        xt = jnp.transpose(x4, (2, 0, 1, 3)).reshape(card, B, n_lanes)

        budget, vmem_limit, cores = _vmem_plan()
        tb, tn = _pick_tiles(B, n_lanes, card, x.dtype.itemsize, budget, cores)
        grid = (pl.cdiv(B, tb), pl.cdiv(n_lanes, tn))

        cp_kwargs = dict(dimension_semantics=("parallel", "parallel"))
        if vmem_limit is not None:
            cp_kwargs["vmem_limit_bytes"] = int(vmem_limit)

        out = pl.pallas_call(
            _group_sum_kernel,
            out_shape=jax.ShapeDtypeStruct((B, n_lanes), x.dtype),
            grid=grid,
            in_specs=[pl.BlockSpec((card, tb, tn), lambda b, n: (0, b, n))],
            out_specs=pl.BlockSpec((tb, tn), lambda b, n: (b, n)),
            compiler_params=pltpu.CompilerParams(**cp_kwargs),
        )(xt)

        # [B, nfull*C] -> [B, nfull, C]: a free reshape, no back-transpose copy.
        outputs.append(out.reshape(B, nfull, C))

    if rem > 0:
        # Ragged tail group: the zero-padded group reduces to a plain sum of the
        # remaining features; do it as a tiny fused XLA reduction (no padded copy).
        tail = jnp.sum(
            x[:, nfull * card :, :].astype(jnp.float32), axis=1, keepdims=True
        ).astype(x.dtype)
        outputs.append(tail)

    if len(outputs) == 1:
        return outputs[0]
    return jnp.concatenate(outputs, axis=1)


class ProductPallas:
    """JAX/Pallas re-implementation of the torch Product layer's forward pass."""

    def __init__(self, in_features, cardinality, min_pallas_elements=1 << 20):
        self.in_features = int(in_features)
        self.cardinality = int(cardinality)
        self._pad = (self.cardinality - self.in_features % self.cardinality) % self.cardinality
        self._out_features = int(np.ceil(self.in_features / self.cardinality))
        self.out_shape = f"(N, {self._out_features}, C_in)"
        # Frozen all-ones conv weight of the torch module (kept for fidelity only;
        # the kernel exploits that it is all ones -> plain grouped sum).
        self.conv_weights = jnp.ones((1, 1, self.cardinality, 1), dtype=jnp.float32)
        # Below this element count a fused XLA reduction beats the Pallas path's
        # launch cost + input relayout (crossover is roughly ~1e6 elements).
        self.min_pallas_elements = int(min_pallas_elements)

    def __call__(self, x):
        B, F, C = x.shape
        if self.cardinality == F:
            # torch fast path: x.sum(1) -> [B, C]
            return jnp.sum(x, axis=1)
        if self.cardinality == 1:
            return x
        if F // self.cardinality == 0 or B * F * C < self.min_pallas_elements:
            return self._jnp_forward(x)
        return _grouped_sum_pallas(x, self.cardinality)

    def _jnp_forward(self, x):
        # XLA fallback: same grouped sum, no padded-input copy (tail summed separately).
        B, F, C = x.shape
        card = self.cardinality
        nfull = F // card
        outs = []
        if nfull > 0:
            main = (
                x[:, : nfull * card, :]
                .reshape(B, nfull, card, C)
                .astype(jnp.float32)
                .sum(axis=2)
                .astype(x.dtype)
            )
            outs.append(main)
        if F - nfull * card > 0:
            tail = jnp.sum(
                x[:, nfull * card :, :].astype(jnp.float32), axis=1, keepdims=True
            ).astype(x.dtype)
            outs.append(tail)
        return outs[0] if len(outs) == 1 else jnp.concatenate(outs, axis=1)


def _reference(x, cardinality):
    """Pure-numpy reference mirroring the torch forward (f32 accumulation)."""
    x = np.asarray(jnp.asarray(x, jnp.float32))
    B, F, C = x.shape
    if cardinality == F:
        return x.sum(1)
    pad = (cardinality - F % cardinality) % cardinality
    if pad > 0:
        x = np.pad(x, ((0, 0), (0, pad), (0, 0)))
    out_f = (F + pad) // cardinality
    return x.reshape(B, out_f, cardinality, C).sum(2)


if __name__ == "__main__":
    key = jax.random.PRNGKey(0)
    k1, k2, k3, k4, k5, k6 = jax.random.split(key, 6)

    # 1) Pallas path, ragged grouping (F=37, card=3 -> out_f=13, tail of 1 feature).
    B, F, C, card = 16, 37, 24, 3
    x = jax.random.normal(k1, (B, F, C), dtype=jnp.float32)
    y = jax.block_until_ready(ProductPallas(F, card, min_pallas_elements=0)(x))
    ref = _reference(x, card)
    assert y.shape == ref.shape, (y.shape, ref.shape)
    np.testing.assert_allclose(np.asarray(y), ref, rtol=1e-5, atol=1e-5)

    # 2) Pallas path, aligned grouping (F=32, card=2), lane axis nfull*C = 256.
    B, F, C, card = 32, 32, 16, 2
    x = jax.random.normal(k2, (B, F, C), dtype=jnp.float32)
    y = jax.block_until_ready(ProductPallas(F, card, min_pallas_elements=0)(x))
    ref = _reference(x, card)
    assert y.shape == ref.shape, (y.shape, ref.shape)
    np.testing.assert_allclose(np.asarray(y), ref, rtol=1e-5, atol=1e-5)

    # 3) Pallas path with bfloat16 input (f32 accumulation, bf16 output writeback).
    B, F, C, card = 16, 40, 16, 4
    xb = jax.random.normal(k3, (B, F, C), dtype=jnp.float32).astype(jnp.bfloat16)
    y = jax.block_until_ready(ProductPallas(F, card, min_pallas_elements=0)(xb))
    ref = _reference(xb, card)
    assert y.shape == ref.shape, (y.shape, ref.shape)
    np.testing.assert_allclose(
        np.asarray(y.astype(jnp.float32)), ref, rtol=2e-2, atol=2e-2
    )

    # 4) cardinality == in_features fast path -> plain sum over features, 2-D output.
    B, F, C = 2, 8, 4
    x = jax.random.normal(k4, (B, F, C), dtype=jnp.float32)
    y = jax.block_until_ready(ProductPallas(F, F)(x))
    ref = _reference(x, F)
    assert y.shape == ref.shape, (y.shape, ref.shape)
    np.testing.assert_allclose(np.asarray(y), ref, rtol=1e-5, atol=1e-5)

    # 5) Tiny input -> XLA fallback path (below the default Pallas dispatch threshold).
    B, F, C, card = 2, 10, 4, 3
    x = jax.random.normal(k5, (B, F, C), dtype=jnp.float32)
    y = jax.block_until_ready(ProductPallas(F, card)(x))
    ref = _reference(x, card)
    assert y.shape == ref.shape, (y.shape, ref.shape)
    np.testing.assert_allclose(np.asarray(y), ref, rtol=1e-5, atol=1e-5)

    # 6) F < cardinality (no complete group): everything is the zero-padded tail.
    B, F, C, card = 4, 3, 8, 5
    x = jax.random.normal(k6, (B, F, C), dtype=jnp.float32)
    y = jax.block_until_ready(ProductPallas(F, card, min_pallas_elements=0)(x))
    ref = _reference(x, card)
    assert y.shape == ref.shape, (y.shape, ref.shape)
    np.testing.assert_allclose(np.asarray(y), ref, rtol=1e-5, atol=1e-5)

    print("KERNEL_OK")
</pallas_src>

<mosaic_0001>
module attributes {stable_mosaic.version = 11 : i64} {
  func.func @_group_sum_kernel(%arg0: i32, %arg1: i32, %arg2: memref<3x16x288xf32, #tpu.memory_space<vmem>>, %arg3: memref<16x288xf32, #tpu.memory_space<vmem>>) attributes {dimension_semantics = [#tpu.dimension_semantics<parallel>, #tpu.dimension_semantics<parallel>], iteration_bounds = array<i64: 1, 1>, scalar_prefetch = 0 : i64, scratch_operands = 0 : i64, tpu.core_type = #tpu.core_type<tc>, window_params = [{transform_indices = @transform_0, window_bounds = array<i64: 3, 16, 288>}, {transform_indices = @transform_1, window_bounds = array<i64: 16, 288>}]} {
    %c0 = arith.constant 0 : index
    %c0_0 = arith.constant 0 : index
    %c0_1 = arith.constant 0 : index
    %0 = vector.load %arg2[%c0, %c0_0, %c0_1] : memref<3x16x288xf32, #tpu.memory_space<vmem>>, vector<1x16x288xf32>
    %1 = vector.shape_cast %0 : vector<1x16x288xf32> to vector<16x288xf32>
    %c1 = arith.constant 1 : index
    %c0_2 = arith.constant 0 : index
    %c0_3 = arith.constant 0 : index
    %2 = vector.load %arg2[%c1, %c0_2, %c0_3] : memref<3x16x288xf32, #tpu.memory_space<vmem>>, vector<1x16x288xf32>
    %3 = vector.shape_cast %2 : vector<1x16x288xf32> to vector<16x288xf32>
    %4 = arith.addf %1, %3 : vector<16x288xf32>
    %c2 = arith.constant 2 : index
    %c0_4 = arith.constant 0 : index
    %c0_5 = arith.constant 0 : index
    %5 = vector.load %arg2[%c2, %c0_4, %c0_5] : memref<3x16x288xf32, #tpu.memory_space<vmem>>, vector<1x16x288xf32>
    %6 = vector.shape_cast %5 : vector<1x16x288xf32> to vector<16x288xf32>
    %7 = arith.addf %4, %6 : vector<16x288xf32>
    %c0_6 = arith.constant 0 : index
    %c0_7 = arith.constant 0 : index
    %8 = vector.load %arg3[%c0_6, %c0_7] : memref<16x288xf32, #tpu.memory_space<vmem>>, vector<16x288xf32>
    tpu.vector_store %arg3[%c0_6, %c0_7], %7 {strides = array<i32>} : memref<16x288xf32, #tpu.memory_space<vmem>>, vector<16x288xf32>,
    return
  }
  func.func @transform_0(%arg0: i32, %arg1: i32) -> (i32, i32, i32) {
    %c0_i32 = arith.constant 0 : i32
    %c0_i32_0 = arith.constant 0 : i32
    return %c0_i32, %arg0, %arg1 : i32, i32, i32
  }
  func.func @transform_1(%arg0: i32, %arg1: i32) -> (i32, i32) {
    %c0_i32 = arith.constant 0 : i32
    return %arg0, %arg1 : i32, i32
  }
}

</mosaic_0001>

<bundles_post_ra>
// kernel: tpu_custom_call.1
= control target key start
LH: loop header
LB: loop body
LE: loop exit
PB: predicated region body
PF: predicated region fallthrough
CT: control target
= control target key end

     0   :  { %6 = vsyncpa [#allocation3], 0  ;;  %s167_s0 = inlined_call_operand.hbm [shape: f32[3,16,288], index: 0, kind: input, shape index: {}]   ;;  %s168_s1 = inlined_call_operand.hbm [shape: f32[16,288], index: 1, kind: output, shape index: {}]  }
   0x1   :  { %7 = vsyncpa [#allocation4], 0  ;;  %s12_s8 = sshll.u32 %s167_s0, 4  ;;  %s139_s9 = smov [#allocation2]   ;;  %s13_s8 = int_to_ptr.hbm [resolvable:$true] %s12_s8 }
   0x2   :  { %s14_s10 = sshll.u32 %s139_s9, 4  ;;  %s140_s11 = smov 384   ;;  %s15_s10 = int_to_ptr.vmem [resolvable:$true] %s14_s10 }
   0x3   :  { %s141_s12 = smov 24  }
   0x4   :  { %20 = dma.hbm_to_vmem [thread:$0]  %s13_s8, 2304, %s15_s10, [#allocation3], %s140_s11, %s140_s11, %s141_s12  }
   0x5   :  { %135 = dma.done.wait [#allocation3], 2304  }
   0x6   :  { %136 = vsyncadd [#allocation3], 4294964992  ;;  %v25_v0 = vld [vmem:[#allocation2] sm:$0xff]  ;;  %v32_v1 = vld [vmem:[#allocation2 + $0x30] sm:$0xff]  ;;  %vm59_vm0 = vcmask 261120   ;;  %s142_s0 = smov [#allocation5]  }
   0x7   :  { %v45_v2 = vld [vmem:[#allocation2 + $0x60] sm:$0xff]  ;;  %v38_v3 = vadd.f32 %v32_v1, %v25_v0  ;;  %v26_v4 = vld [vmem:[#allocation2 + $0x8] sm:$0xff]  ;;  %v33_v5 = vld [vmem:[#allocation2 + $0x38] sm:$0xff]  ;;  %s68_s13 = sshll.u32 %s142_s0, 4  ;;  %s70_s16 = sshll.u32 %s168_s1, 4  ;;  %s69_s13 = int_to_ptr.vmem [resolvable:$true] %s68_s13  ;;  %s71_s16 = int_to_ptr.hbm [resolvable:$true] %s70_s16 }
   0x8   :  { %v46_v6 = vld [vmem:[#allocation2 + $0x68] sm:$0xff]  ;;  %v39_v7 = vadd.f32 %v33_v5, %v26_v4  ;;  %v27_v8 = vld [vmem:[#allocation2 + $0x10] sm:$0xff]  ;;  %v34_v9 = vld [vmem:[#allocation2 + $0x40] sm:$0xff] }
   0x9   :  { %v47_v10 = vld [vmem:[#allocation2 + $0x70] sm:$0xff]  ;;  %v51_v11 = vadd.f32 %v45_v2, %v38_v3  ;;  %v40_v12 = vadd.f32 %v34_v9, %v27_v8  ;;  %v28_v13 = vld [vmem:[#allocation2 + $0x18] sm:$0xff]  ;;  %v35_v14 = vld [vmem:[#allocation2 + $0x48] sm:$0xff] }
   0xa   :  { %v48_v15 = vld [vmem:[#allocation2 + $0x78] sm:$0xff]  ;;  %v52_v16 = vadd.f32 %v46_v6, %v39_v7  ;;  %v41_v17 = vadd.f32 %v35_v14, %v28_v13  ;;  %v29_v18 = vld [vmem:[#allocation2 + $0x20] sm:$0xff]  ;;  %v36_v19 = vld [vmem:[#allocation2 + $0x50] sm:$0xff] }
   0xb   :  { %v49_v20 = vld [vmem:[#allocation2 + $0x80] sm:$0xff]  ;;  %57 = vst [vmem:[#allocation5] sm:$0xff] %v51_v11  ;;  %v53_v21 = vadd.f32 %v47_v10, %v40_v12  ;;  %v42_v22 = vadd.f32 %v36_v19, %v29_v18  ;;  %v30_v23 = vld [vmem:[#allocation2 + $0x28] sm:$0xff]  ;;  %v37_v24 = vld [vmem:[#allocation2 + $0x58] sm:$0xff] }
   0xc   :  { %v50_v25 = vld [vmem:[#allocation2 + $0x88] sm:$0xff]  ;;  %58 = vst [vmem:[#allocation5 + $0x8] sm:$0xff] %v52_v16  ;;  %v54_v26 = vadd.f32 %v48_v15, %v41_v17  ;;  %v43_v27 = vadd.f32 %v37_v24, %v30_v23 }
   0xd   :  { %60 = vst.msk [vmem:[#allocation5 + $0x10] sm:$0xff] %vm59_vm0, %v53_v21  ;;  %v55_v28 = vadd.f32 %v49_v20, %v42_v22 }
   0xe   :  { %61 = vst [vmem:[#allocation5 + $0x18] sm:$0xff] %v54_v26  ;;  %v56_v29 = vadd.f32 %v50_v25, %v43_v27 }
   0xf   :  { %62 = vst [vmem:[#allocation5 + $0x20] sm:$0xff] %v55_v28 }
  0x10   :  { %63 = vst.msk [vmem:[#allocation5 + $0x28] sm:$0xff] %vm59_vm0, %v56_v29 }
  0x11   :  { %76 = dma.vmem_to_hbm [thread:$0]  %s69_s13, 768, %s71_s16, [#allocation4], %s140_s11, %s140_s11, %s141_s12  }
  0x12   :  { %137 = dma.done.wait [#allocation4], 768  }
  0x13   :  { %138 = vsyncadd [#allocation4], 4294966528 }
  0x14   :  { %81 = vsyncpa [#allocation3], 1 }
  0x15   :  { %82 = vsyncpa [#allocation4], 1 }

</bundles_post_ra>
